<compile_context>
chip_gen: v5e
topology: v5e:2x2
jax: 0.10.0
libtpu: 0.0.40
codegen_flags: <defaults>
</compile_context>

<pallas_src>
import jax
import jax.numpy as jnp
from jax.experimental import pallas as pl
from jax.experimental.pallas import tpu as pltpu


def _resblock_kernel(x_ref, m1_ref, m2_ref, q_ref, g1_ref, b1_ref, g2_ref, b2_ref,
                     o_ref, pad_ref):
    # x_ref:   (N, H, L) lane-dense input, L = W*C
    # m*_ref:  (3, L, L) banded conv weights (one matrix per dy tap row)
    # q_ref:   (L, L) channel-pooling matrix, pre-scaled by 1/(N*H*W)
    # g*/b*:   (1, L) gamma/beta pre-tiled to the lane-dense layout
    # pad_ref: (N, H+2, L) scratch, 1-row top/bottom halo per image
    N, H, L = x_ref.shape
    rows = N * H
    eps = jnp.float32(1e-5)

    # Zero only the 1-row halo (interior is overwritten before each conv).
    pad_ref[:, 0:1, :] = jnp.zeros((N, 1, L), jnp.float32)
    pad_ref[:, H + 1:H + 2, :] = jnp.zeros((N, 1, L), jnp.float32)

    q = q_ref[...]
    g1 = g1_ref[...]
    b1 = b1_ref[...]
    g2 = g2_ref[...]
    b2 = b2_ref[...]

    def conv3x3(h_nhl, m_ref):
        # 3 accumulating MXU matmuls (K = L = 128, 128 output lanes).
        pad_ref[:, 1:H + 1, :] = h_nhl
        acc = jnp.zeros((rows, L), jnp.float32)
        for dy in range(3):  # static unroll
            tap = pad_ref[:, dy:dy + H, :].reshape(rows, L)
            acc = acc + jnp.dot(tap, m_ref[dy], preferred_element_type=jnp.float32)
        return acc  # (rows, L) f32, lane-dense

    def batchnorm(h, g_dense, b_dense):
        # Two-pass training-mode BN entirely in the lane-dense layout.
        col_s = jnp.sum(h, axis=0, keepdims=True)                       # (1, L)
        mean = jnp.dot(col_s, q, preferred_element_type=jnp.float32)    # per-channel mean, dense
        d = h - mean
        col_ss = jnp.sum(d * d, axis=0, keepdims=True)                  # (1, L)
        var = jnp.dot(col_ss, q, preferred_element_type=jnp.float32)    # biased variance, dense
        scale = g_dense * jax.lax.rsqrt(var + eps)                      # (1, L)
        shift = b_dense - mean * scale
        return h * scale + shift                                        # full-width VPU FMA

    def elu(h):
        # clamp before exp so the discarded branch never overflows
        return jnp.where(h > 0, h, jnp.exp(jnp.minimum(h, 0.0)) - 1.0)

    x3 = x_ref[...].astype(jnp.float32)          # (N, H, L)
    x = x3.reshape(rows, L)

    h = conv3x3(x3, m1_ref)                      # (rows, L)
    h = elu(batchnorm(h, g1, b1))
    h = conv3x3(h.reshape(N, H, L), m2_ref)
    h = batchnorm(h, g2, b2)
    o_ref[...] = elu(h + x).astype(o_ref.dtype)  # lane-dense, unmasked vst


def _band_matrices(w_oihw, W):
    """Conv weight (C_out, C_in, 3, 3) -> (3, W*C_in, W*C_out) banded matrices.

    conv(x)[n, h, :] (lane-dense over (w, c_out)) = sum_dy x_pad[n, h+dy, :] @ M[dy],
    where x_pad rows are lane-dense over (w, c_in) with a zero 1-row halo in h.
    """
    c_out, c_in = w_oihw.shape[0], w_oihw.shape[1]
    w_t = jnp.transpose(w_oihw, (2, 3, 1, 0)).astype(jnp.float32)    # (3, 3, C_in, C_out)
    wi = jnp.arange(W)[:, None]
    wo = jnp.arange(W)[None, :]
    dx = wi - wo + 1                                                 # (W, W)
    valid = ((dx >= 0) & (dx <= 2)).astype(jnp.float32)
    blocks = w_t[:, jnp.clip(dx, 0, 2)]                              # (3, W, W, C_in, C_out)
    blocks = blocks * valid[None, :, :, None, None]
    return jnp.transpose(blocks, (0, 1, 3, 2, 4)).reshape(3, W * c_in, W * c_out)


def _channel_pool_matrix(W, C, count):
    """Q[w1*C+c1, w2*C+c2] = (c1 == c2) / count  -> per-channel sum + dense broadcast."""
    c1 = jnp.arange(W * C)[:, None] % C
    c2 = jnp.arange(W * C)[None, :] % C
    return (c1 == c2).astype(jnp.float32) / jnp.float32(count)


def residual_block(x_nchw, w1_oihw, g1, b1, w2_oihw, g2, b2):
    """PyTorch-compatible wrapper. x_nchw: (N, C, H, W); conv weights (O, I, 3, 3)."""
    N, C, H, W = x_nchw.shape
    L = W * C
    # TODO(synk): keep the surrounding model in this lane-dense layout so the
    # NCHW<->lane-dense transposes below do not bracket every residual block.
    x_d = jnp.transpose(x_nchw, (0, 2, 3, 1)).reshape(N, H, L).astype(jnp.float32)

    m1 = _band_matrices(w1_oihw, W)                      # (3, L, L)
    m2 = _band_matrices(w2_oihw, W)                      # (3, L, L)
    q = _channel_pool_matrix(W, C, N * H * W)            # (L, L), pre-scaled
    g1d = jnp.tile(g1.reshape(1, C).astype(jnp.float32), (1, W))
    b1d = jnp.tile(b1.reshape(1, C).astype(jnp.float32), (1, W))
    g2d = jnp.tile(g2.reshape(1, C).astype(jnp.float32), (1, W))
    b2d = jnp.tile(b2.reshape(1, C).astype(jnp.float32), (1, W))

    vmem = pl.BlockSpec(memory_space=pltpu.MemorySpace.VMEM)
    out_dense = pl.pallas_call(
        _resblock_kernel,
        out_shape=jax.ShapeDtypeStruct((N * H, L), jnp.float32),
        in_specs=[vmem] * 8,
        out_specs=vmem,
        scratch_shapes=[pltpu.VMEM((N, H + 2, L), jnp.float32)],
        compiler_params=pltpu.CompilerParams(vmem_limit_bytes=32 * 1024 * 1024),
    )(x_d, m1, m2, q, g1d, b1d, g2d, b2d)

    out = out_dense.reshape(N, H, W, C)
    return jnp.transpose(out, (0, 3, 1, 2)).astype(x_nchw.dtype)


def _reference(x_nchw, w1, g1, b1, w2, g2, b2, eps=1e-5):
    """Pure-JAX reference mirroring PyTorch training-mode forward."""
    def conv(x, w):
        return jax.lax.conv_general_dilated(
            x, w, window_strides=(1, 1), padding=((1, 1), (1, 1)),
            dimension_numbers=("NCHW", "OIHW", "NCHW"))

    def bn(x, g, b):
        mean = jnp.mean(x, axis=(0, 2, 3), keepdims=True)
        var = jnp.mean(jnp.square(x - mean), axis=(0, 2, 3), keepdims=True)
        return (x - mean) * jax.lax.rsqrt(var + eps) \
            * g.reshape(1, -1, 1, 1) + b.reshape(1, -1, 1, 1)

    def elu(x):
        return jnp.where(x > 0, x, jnp.exp(jnp.minimum(x, 0.0)) - 1.0)

    h = elu(bn(conv(x_nchw, w1), g1, b1))
    h = bn(conv(h, w2), g2, b2)
    return elu(h + x_nchw)


if __name__ == "__main__":
    # residual add requires in_planes == out_planes; W*C = 128 lanes.
    N, C, H, W = 2, 8, 16, 16
    key = jax.random.PRNGKey(0)
    k0, k1, k2 = jax.random.split(key, 3)

    x = jax.random.normal(k0, (N, C, H, W), jnp.float32)
    # conv weights: (out_planes, in_planes, 3, 3), bias=False
    w1 = jax.random.normal(k1, (C, C, 3, 3), jnp.float32) * 0.1
    w2 = jax.random.normal(k2, (C, C, 3, 3), jnp.float32) * 0.1
    # BatchNorm affine params (PyTorch default init: weight=1, bias=0)
    g1 = jnp.ones((C,), jnp.float32)
    b1 = jnp.zeros((C,), jnp.float32)
    g2 = jnp.ones((C,), jnp.float32)
    b2 = jnp.zeros((C,), jnp.float32)

    out = residual_block(x, w1, g1, b1, w2, g2, b2)
    out = jax.block_until_ready(out)

    ref = _reference(x, w1, g1, b1, w2, g2, b2)
    assert out.shape == (N, C, H, W)
    assert jnp.allclose(out, ref, atol=1e-3, rtol=1e-3), "mismatch vs reference"

    print("KERNEL_OK")
</pallas_src>

<mosaic_0001>
module attributes {stable_mosaic.version = 11 : i64} {
  func.func @_resblock_kernel(%arg0: memref<2x16x128xf32, #tpu.memory_space<vmem>>, %arg1: memref<3x128x128xf32, #tpu.memory_space<vmem>>, %arg2: memref<3x128x128xf32, #tpu.memory_space<vmem>>, %arg3: memref<128x128xf32, #tpu.memory_space<vmem>>, %arg4: memref<1x128xf32, #tpu.memory_space<vmem>>, %arg5: memref<1x128xf32, #tpu.memory_space<vmem>>, %arg6: memref<1x128xf32, #tpu.memory_space<vmem>>, %arg7: memref<1x128xf32, #tpu.memory_space<vmem>>, %arg8: memref<32x128xf32, #tpu.memory_space<vmem>>, %arg9: memref<2x18x128xf32, #tpu.memory_space<vmem>>) attributes {dimension_semantics = [], scalar_prefetch = 0 : i64, scratch_operands = 1 : i64, tpu.core_type = #tpu.core_type<tc>} {
    %cst = arith.constant 0.000000e+00 : f32
    %0 = vector.broadcast %cst : f32 to vector<2x1x128xf32>
    %c0 = arith.constant 0 : index
    %c0_0 = arith.constant 0 : index
    %c0_1 = arith.constant 0 : index
    %1 = vector.load %arg9[%c0, %c0_0, %c0_1] : memref<2x18x128xf32, #tpu.memory_space<vmem>>, vector<2x1x128xf32>
    tpu.vector_store %arg9[%c0, %c0_0, %c0_1], %0 {strides = array<i32>} : memref<2x18x128xf32, #tpu.memory_space<vmem>>, vector<2x1x128xf32>,
    %cst_2 = arith.constant 0.000000e+00 : f32
    %2 = vector.broadcast %cst_2 : f32 to vector<2x1x128xf32>
    %c0_3 = arith.constant 0 : index
    %c17 = arith.constant 17 : index
    %c0_4 = arith.constant 0 : index
    %3 = vector.load %arg9[%c0_3, %c17, %c0_4] : memref<2x18x128xf32, #tpu.memory_space<vmem>>, vector<2x1x128xf32>
    tpu.vector_store %arg9[%c0_3, %c17, %c0_4], %2 {strides = array<i32>} : memref<2x18x128xf32, #tpu.memory_space<vmem>>, vector<2x1x128xf32>,
    %c0_5 = arith.constant 0 : index
    %c0_6 = arith.constant 0 : index
    %4 = vector.load %arg3[%c0_5, %c0_6] : memref<128x128xf32, #tpu.memory_space<vmem>>, vector<128x128xf32>
    %c0_7 = arith.constant 0 : index
    %c0_8 = arith.constant 0 : index
    %5 = vector.load %arg4[%c0_7, %c0_8] : memref<1x128xf32, #tpu.memory_space<vmem>>, vector<1x128xf32>
    %c0_9 = arith.constant 0 : index
    %c0_10 = arith.constant 0 : index
    %6 = vector.load %arg5[%c0_9, %c0_10] : memref<1x128xf32, #tpu.memory_space<vmem>>, vector<1x128xf32>
    %c0_11 = arith.constant 0 : index
    %c0_12 = arith.constant 0 : index
    %7 = vector.load %arg6[%c0_11, %c0_12] : memref<1x128xf32, #tpu.memory_space<vmem>>, vector<1x128xf32>
    %c0_13 = arith.constant 0 : index
    %c0_14 = arith.constant 0 : index
    %8 = vector.load %arg7[%c0_13, %c0_14] : memref<1x128xf32, #tpu.memory_space<vmem>>, vector<1x128xf32>
    %c0_15 = arith.constant 0 : index
    %c0_16 = arith.constant 0 : index
    %c0_17 = arith.constant 0 : index
    %9 = vector.load %arg0[%c0_15, %c0_16, %c0_17] : memref<2x16x128xf32, #tpu.memory_space<vmem>>, vector<2x16x128xf32>
    %10 = vector.shape_cast %9 : vector<2x16x128xf32> to vector<32x128xf32>
    %c0_18 = arith.constant 0 : index
    %c1 = arith.constant 1 : index
    %c0_19 = arith.constant 0 : index
    %11 = vector.load %arg9[%c0_18, %c1, %c0_19] : memref<2x18x128xf32, #tpu.memory_space<vmem>>, vector<2x16x128xf32>
    tpu.vector_store %arg9[%c0_18, %c1, %c0_19], %9 {strides = array<i32>} : memref<2x18x128xf32, #tpu.memory_space<vmem>>, vector<2x16x128xf32>,
    %cst_20 = arith.constant 0.000000e+00 : f32
    %12 = vector.broadcast %cst_20 : f32 to vector<32x128xf32>
    %c0_21 = arith.constant 0 : index
    %c0_22 = arith.constant 0 : index
    %c0_23 = arith.constant 0 : index
    %13 = vector.load %arg9[%c0_21, %c0_22, %c0_23] : memref<2x18x128xf32, #tpu.memory_space<vmem>>, vector<2x16x128xf32>
    %14 = vector.shape_cast %13 : vector<2x16x128xf32> to vector<32x128xf32>
    %c0_24 = arith.constant 0 : index
    %c0_25 = arith.constant 0 : index
    %c0_26 = arith.constant 0 : index
    %15 = vector.load %arg1[%c0_24, %c0_25, %c0_26] : memref<3x128x128xf32, #tpu.memory_space<vmem>>, vector<1x128x128xf32>
    %16 = vector.shape_cast %15 : vector<1x128x128xf32> to vector<128x128xf32>
    %cst_27 = arith.constant dense<0.000000e+00> : vector<32x128xf32>
    %17 = tpu.matmul %14, %16, %cst_27 {dimension_numbers = #tpu.dot_dimension_numbers<[1], [0], [0], [1], [0, 0, 1, 1], [], []>} : vector<32x128xf32>, vector<128x128xf32>, vector<32x128xf32> -> vector<32x128xf32>
    %18 = arith.addf %12, %17 : vector<32x128xf32>
    %c0_28 = arith.constant 0 : index
    %c1_29 = arith.constant 1 : index
    %c0_30 = arith.constant 0 : index
    %19 = vector.load %arg9[%c0_28, %c1_29, %c0_30] : memref<2x18x128xf32, #tpu.memory_space<vmem>>, vector<2x16x128xf32>
    %20 = vector.shape_cast %19 : vector<2x16x128xf32> to vector<32x128xf32>
    %c1_31 = arith.constant 1 : index
    %c0_32 = arith.constant 0 : index
    %c0_33 = arith.constant 0 : index
    %21 = vector.load %arg1[%c1_31, %c0_32, %c0_33] : memref<3x128x128xf32, #tpu.memory_space<vmem>>, vector<1x128x128xf32>
    %22 = vector.shape_cast %21 : vector<1x128x128xf32> to vector<128x128xf32>
    %cst_34 = arith.constant dense<0.000000e+00> : vector<32x128xf32>
    %23 = tpu.matmul %20, %22, %cst_34 {dimension_numbers = #tpu.dot_dimension_numbers<[1], [0], [0], [1], [0, 0, 1, 1], [], []>} : vector<32x128xf32>, vector<128x128xf32>, vector<32x128xf32> -> vector<32x128xf32>
    %24 = arith.addf %18, %23 : vector<32x128xf32>
    %c0_35 = arith.constant 0 : index
    %c2 = arith.constant 2 : index
    %c0_36 = arith.constant 0 : index
    %25 = vector.load %arg9[%c0_35, %c2, %c0_36] : memref<2x18x128xf32, #tpu.memory_space<vmem>>, vector<2x16x128xf32>
    %26 = vector.shape_cast %25 : vector<2x16x128xf32> to vector<32x128xf32>
    %c2_37 = arith.constant 2 : index
    %c0_38 = arith.constant 0 : index
    %c0_39 = arith.constant 0 : index
    %27 = vector.load %arg1[%c2_37, %c0_38, %c0_39] : memref<3x128x128xf32, #tpu.memory_space<vmem>>, vector<1x128x128xf32>
    %28 = vector.shape_cast %27 : vector<1x128x128xf32> to vector<128x128xf32>
    %cst_40 = arith.constant dense<0.000000e+00> : vector<32x128xf32>
    %29 = tpu.matmul %26, %28, %cst_40 {dimension_numbers = #tpu.dot_dimension_numbers<[1], [0], [0], [1], [0, 0, 1, 1], [], []>} : vector<32x128xf32>, vector<128x128xf32>, vector<32x128xf32> -> vector<32x128xf32>
    %30 = arith.addf %24, %29 : vector<32x128xf32>
    %cst_41 = arith.constant dense<0.000000e+00> : vector<128xf32>
    %31 = vector.multi_reduction <add>, %30, %cst_41 [0] : vector<32x128xf32> to vector<128xf32>
    %32 = vector.shape_cast %31 : vector<128xf32> to vector<1x128xf32>
    %cst_42 = arith.constant dense<0.000000e+00> : vector<1x128xf32>
    %33 = tpu.matmul %32, %4, %cst_42 {dimension_numbers = #tpu.dot_dimension_numbers<[1], [0], [0], [1], [0, 0, 1, 1], [], []>} : vector<1x128xf32>, vector<128x128xf32>, vector<1x128xf32> -> vector<1x128xf32>
    %34 = vector.broadcast %33 : vector<1x128xf32> to vector<32x128xf32>
    %35 = arith.subf %30, %34 : vector<32x128xf32>
    %36 = arith.mulf %35, %35 : vector<32x128xf32>
    %cst_43 = arith.constant dense<0.000000e+00> : vector<128xf32>
    %37 = vector.multi_reduction <add>, %36, %cst_43 [0] : vector<32x128xf32> to vector<128xf32>
    %38 = vector.shape_cast %37 : vector<128xf32> to vector<1x128xf32>
    %cst_44 = arith.constant dense<0.000000e+00> : vector<1x128xf32>
    %39 = tpu.matmul %38, %4, %cst_44 {dimension_numbers = #tpu.dot_dimension_numbers<[1], [0], [0], [1], [0, 0, 1, 1], [], []>} : vector<1x128xf32>, vector<128x128xf32>, vector<1x128xf32> -> vector<1x128xf32>
    %cst_45 = arith.constant 9.99999974E-6 : f32
    %40 = vector.broadcast %cst_45 : f32 to vector<1x128xf32>
    %41 = arith.addf %39, %40 : vector<1x128xf32>
    %42 = math.rsqrt %41 : vector<1x128xf32>
    %43 = arith.mulf %5, %42 : vector<1x128xf32>
    %44 = arith.mulf %33, %43 : vector<1x128xf32>
    %45 = arith.subf %6, %44 : vector<1x128xf32>
    %46 = vector.broadcast %43 : vector<1x128xf32> to vector<32x128xf32>
    %47 = arith.mulf %30, %46 : vector<32x128xf32>
    %48 = vector.broadcast %45 : vector<1x128xf32> to vector<32x128xf32>
    %49 = arith.addf %47, %48 : vector<32x128xf32>
    %cst_46 = arith.constant 0.000000e+00 : f32
    %50 = vector.broadcast %cst_46 : f32 to vector<32x128xf32>
    %51 = arith.cmpf ogt, %49, %50 : vector<32x128xf32>
    %cst_47 = arith.constant 0.000000e+00 : f32
    %52 = vector.broadcast %cst_47 : f32 to vector<32x128xf32>
    %53 = arith.minimumf %49, %52 : vector<32x128xf32>
    %54 = math.exp %53 : vector<32x128xf32>
    %cst_48 = arith.constant 1.000000e+00 : f32
    %55 = vector.broadcast %cst_48 : f32 to vector<32x128xf32>
    %56 = arith.subf %54, %55 : vector<32x128xf32>
    %57 = arith.select %51, %49, %56 : vector<32x128xi1>, vector<32x128xf32>
    %58 = vector.shape_cast %57 : vector<32x128xf32> to vector<2x16x128xf32>
    %c0_49 = arith.constant 0 : index
    %c1_50 = arith.constant 1 : index
    %c0_51 = arith.constant 0 : index
    %59 = vector.load %arg9[%c0_49, %c1_50, %c0_51] : memref<2x18x128xf32, #tpu.memory_space<vmem>>, vector<2x16x128xf32>
    tpu.vector_store %arg9[%c0_49, %c1_50, %c0_51], %58 {strides = array<i32>} : memref<2x18x128xf32, #tpu.memory_space<vmem>>, vector<2x16x128xf32>,
    %cst_52 = arith.constant 0.000000e+00 : f32
    %60 = vector.broadcast %cst_52 : f32 to vector<32x128xf32>
    %c0_53 = arith.constant 0 : index
    %c0_54 = arith.constant 0 : index
    %c0_55 = arith.constant 0 : index
    %61 = vector.load %arg9[%c0_53, %c0_54, %c0_55] : memref<2x18x128xf32, #tpu.memory_space<vmem>>, vector<2x16x128xf32>
    %62 = vector.shape_cast %61 : vector<2x16x128xf32> to vector<32x128xf32>
    %c0_56 = arith.constant 0 : index
    %c0_57 = arith.constant 0 : index
    %c0_58 = arith.constant 0 : index
    %63 = vector.load %arg2[%c0_56, %c0_57, %c0_58] : memref<3x128x128xf32, #tpu.memory_space<vmem>>, vector<1x128x128xf32>
    %64 = vector.shape_cast %63 : vector<1x128x128xf32> to vector<128x128xf32>
    %cst_59 = arith.constant dense<0.000000e+00> : vector<32x128xf32>
    %65 = tpu.matmul %62, %64, %cst_59 {dimension_numbers = #tpu.dot_dimension_numbers<[1], [0], [0], [1], [0, 0, 1, 1], [], []>} : vector<32x128xf32>, vector<128x128xf32>, vector<32x128xf32> -> vector<32x128xf32>
    %66 = arith.addf %60, %65 : vector<32x128xf32>
    %c0_60 = arith.constant 0 : index
    %c1_61 = arith.constant 1 : index
    %c0_62 = arith.constant 0 : index
    %67 = vector.load %arg9[%c0_60, %c1_61, %c0_62] : memref<2x18x128xf32, #tpu.memory_space<vmem>>, vector<2x16x128xf32>
    %68 = vector.shape_cast %67 : vector<2x16x128xf32> to vector<32x128xf32>
    %c1_63 = arith.constant 1 : index
    %c0_64 = arith.constant 0 : index
    %c0_65 = arith.constant 0 : index
    %69 = vector.load %arg2[%c1_63, %c0_64, %c0_65] : memref<3x128x128xf32, #tpu.memory_space<vmem>>, vector<1x128x128xf32>
    %70 = vector.shape_cast %69 : vector<1x128x128xf32> to vector<128x128xf32>
    %cst_66 = arith.constant dense<0.000000e+00> : vector<32x128xf32>
    %71 = tpu.matmul %68, %70, %cst_66 {dimension_numbers = #tpu.dot_dimension_numbers<[1], [0], [0], [1], [0, 0, 1, 1], [], []>} : vector<32x128xf32>, vector<128x128xf32>, vector<32x128xf32> -> vector<32x128xf32>
    %72 = arith.addf %66, %71 : vector<32x128xf32>
    %c0_67 = arith.constant 0 : index
    %c2_68 = arith.constant 2 : index
    %c0_69 = arith.constant 0 : index
    %73 = vector.load %arg9[%c0_67, %c2_68, %c0_69] : memref<2x18x128xf32, #tpu.memory_space<vmem>>, vector<2x16x128xf32>
    %74 = vector.shape_cast %73 : vector<2x16x128xf32> to vector<32x128xf32>
    %c2_70 = arith.constant 2 : index
    %c0_71 = arith.constant 0 : index
    %c0_72 = arith.constant 0 : index
    %75 = vector.load %arg2[%c2_70, %c0_71, %c0_72] : memref<3x128x128xf32, #tpu.memory_space<vmem>>, vector<1x128x128xf32>
    %76 = vector.shape_cast %75 : vector<1x128x128xf32> to vector<128x128xf32>
    %cst_73 = arith.constant dense<0.000000e+00> : vector<32x128xf32>
    %77 = tpu.matmul %74, %76, %cst_73 {dimension_numbers = #tpu.dot_dimension_numbers<[1], [0], [0], [1], [0, 0, 1, 1], [], []>} : vector<32x128xf32>, vector<128x128xf32>, vector<32x128xf32> -> vector<32x128xf32>
    %78 = arith.addf %72, %77 : vector<32x128xf32>
    %cst_74 = arith.constant dense<0.000000e+00> : vector<128xf32>
    %79 = vector.multi_reduction <add>, %78, %cst_74 [0] : vector<32x128xf32> to vector<128xf32>
    %80 = vector.shape_cast %79 : vector<128xf32> to vector<1x128xf32>
    %cst_75 = arith.constant dense<0.000000e+00> : vector<1x128xf32>
    %81 = tpu.matmul %80, %4, %cst_75 {dimension_numbers = #tpu.dot_dimension_numbers<[1], [0], [0], [1], [0, 0, 1, 1], [], []>} : vector<1x128xf32>, vector<128x128xf32>, vector<1x128xf32> -> vector<1x128xf32>
    %82 = vector.broadcast %81 : vector<1x128xf32> to vector<32x128xf32>
    %83 = arith.subf %78, %82 : vector<32x128xf32>
    %84 = arith.mulf %83, %83 : vector<32x128xf32>
    %cst_76 = arith.constant dense<0.000000e+00> : vector<128xf32>
    %85 = vector.multi_reduction <add>, %84, %cst_76 [0] : vector<32x128xf32> to vector<128xf32>
    %86 = vector.shape_cast %85 : vector<128xf32> to vector<1x128xf32>
    %cst_77 = arith.constant dense<0.000000e+00> : vector<1x128xf32>
    %87 = tpu.matmul %86, %4, %cst_77 {dimension_numbers = #tpu.dot_dimension_numbers<[1], [0], [0], [1], [0, 0, 1, 1], [], []>} : vector<1x128xf32>, vector<128x128xf32>, vector<1x128xf32> -> vector<1x128xf32>
    %cst_78 = arith.constant 9.99999974E-6 : f32
    %88 = vector.broadcast %cst_78 : f32 to vector<1x128xf32>
    %89 = arith.addf %87, %88 : vector<1x128xf32>
    %90 = math.rsqrt %89 : vector<1x128xf32>
    %91 = arith.mulf %7, %90 : vector<1x128xf32>
    %92 = arith.mulf %81, %91 : vector<1x128xf32>
    %93 = arith.subf %8, %92 : vector<1x128xf32>
    %94 = vector.broadcast %91 : vector<1x128xf32> to vector<32x128xf32>
    %95 = arith.mulf %78, %94 : vector<32x128xf32>
    %96 = vector.broadcast %93 : vector<1x128xf32> to vector<32x128xf32>
    %97 = arith.addf %95, %96 : vector<32x128xf32>
    %98 = arith.addf %97, %10 : vector<32x128xf32>
    %cst_79 = arith.constant 0.000000e+00 : f32
    %99 = vector.broadcast %cst_79 : f32 to vector<32x128xf32>
    %100 = arith.cmpf ogt, %98, %99 : vector<32x128xf32>
    %cst_80 = arith.constant 0.000000e+00 : f32
    %101 = vector.broadcast %cst_80 : f32 to vector<32x128xf32>
    %102 = arith.minimumf %98, %101 : vector<32x128xf32>
    %103 = math.exp %102 : vector<32x128xf32>
    %cst_81 = arith.constant 1.000000e+00 : f32
    %104 = vector.broadcast %cst_81 : f32 to vector<32x128xf32>
    %105 = arith.subf %103, %104 : vector<32x128xf32>
    %106 = arith.select %100, %98, %105 : vector<32x128xi1>, vector<32x128xf32>
    %c0_82 = arith.constant 0 : index
    %c0_83 = arith.constant 0 : index
    %107 = vector.load %arg8[%c0_82, %c0_83] : memref<32x128xf32, #tpu.memory_space<vmem>>, vector<32x128xf32>
    tpu.vector_store %arg8[%c0_82, %c0_83], %106 {strides = array<i32>} : memref<32x128xf32, #tpu.memory_space<vmem>>, vector<32x128xf32>,
    return
  }
}

</mosaic_0001>

<bundles_post_ra>
// kernel: tpu_custom_call.1
= control target key start
LH: loop header
LB: loop body
LE: loop exit
PB: predicated region body
PF: predicated region fallthrough
CT: control target
= control target key end

     0   :  { %13 = vsyncpa [#allocation4], 0  ;;  %s1104_s0 = inlined_call_operand.hbm [shape: f32[2,16,128], index: 0, kind: input, shape index: {}]   ;;  %s1105_s1 = inlined_call_operand.hbm [shape: f32[3,128,128], index: 1, kind: input, shape index: {}]   ;;  %s1106_s2 = inlined_call_operand.hbm [shape: f32[3,128,128], index: 2, kind: input, shape index: {}]   ;;  %s1107_s3 = inlined_call_operand.hbm [shape: f32[128,128], index: 3, kind: input, shape index: {}]   ;;  %s1108_s4 = inlined_call_operand.vmem [shape: f32[1,128], index: 4, kind: input, shape index: {}]   ;;  %s1109_s5 = inlined_call_operand.vmem [shape: f32[1,128], index: 5, kind: input, shape index: {}]   ;;  %s1110_s6 = inlined_call_operand.vmem [shape: f32[1,128], index: 6, kind: input, shape index: {}]   ;;  %s1111_s7 = inlined_call_operand.vmem [shape: f32[1,128], index: 7, kind: input, shape index: {}]   ;;  %s1112_s8 = inlined_call_operand.hbm [shape: f32[32,128], index: 8, kind: output, shape index: {}]  }
   0x1   :  { %14 = vsyncpa [#allocation7], 0 }
   0x2   :  { %15 = vsyncpa [#allocation10], 0 }
   0x3   :  { %16 = vsyncpa [#allocation5], 0  ;;  %s34_s29 = sshll.u32 %s1105_s1, 4  ;;  %s864_s30 = smov [#allocation6]   ;;  %s35_s29 = int_to_ptr.hbm [resolvable:$true] %s34_s29 }
   0x4   :  { %s36_s9 = sshll.u32 %s864_s30, 4  ;;  %s21_s12 = sshll.u32 %s1104_s0, 4  ;;  %s37_s9 = int_to_ptr.vmem [resolvable:$true] %s36_s9  ;;  %s22_s12 = int_to_ptr.hbm [resolvable:$true] %s21_s12 }
   0x5   :  { %s865_s13 = smov 128   ;;  %s866_s14 = smov 8  }
   0x6   :  { %42 = dma.hbm_to_vmem [thread:$0]  %s35_s29, 6144, %s37_s9, [#allocation7], %s865_s13, %s865_s13, %s866_s14  }
   0x7   :  { %s867_s15 = smov [#allocation3]   ;;  %s47_s1 = sshll.u32 %s1106_s2, 4  ;;  %s48_s1 = int_to_ptr.hbm [resolvable:$true] %s47_s1 }
   0x8   :  { %s23_s16 = sshll.u32 %s867_s15, 4  ;;  %s60_s20 = sshll.u32 %s1107_s3, 4  ;;  %s24_s16 = int_to_ptr.vmem [resolvable:$true] %s23_s16  ;;  %s61_s20 = int_to_ptr.hbm [resolvable:$true] %s60_s20 }
   0x9   :  { %29 = dma.hbm_to_vmem [thread:$0]  %s22_s12, 512, %s24_s16, [#allocation4], %s865_s13, %s865_s13, %s866_s14  }
   0xa   :  { %s868_s21 = smov [#allocation8]   ;;  %s869_s23 = smov [#allocation9]  }
   0xb   :  { %s49_s22 = sshll.u32 %s868_s21, 4  ;;  %s62_s2 = sshll.u32 %s869_s23, 4  ;;  %s50_s22 = int_to_ptr.vmem [resolvable:$true] %s49_s22  ;;  %s63_s2 = int_to_ptr.vmem [resolvable:$true] %s62_s2 }
   0xc   :  { %55 = dma.hbm_to_vmem [thread:$0]  %s48_s1, 6144, %s50_s22, [#allocation7], %s865_s13, %s865_s13, %s866_s14  }
   0xd   :  { %68 = dma.hbm_to_vmem [thread:$0]  %s61_s20, 2048, %s63_s2, [#allocation10], %s865_s13, %s865_s13, %s866_s14  }
   0xe   :  { %856 = dma.done.wait [#allocation4], 512  }
   0xf   :  { %857 = vsyncadd [#allocation4], 4294966784 }
  0x10   :  { %858 = dma.done.wait [#allocation7], 12288  }
  0x11   :  { %859 = vsyncadd [#allocation7], 4294955008 }
  0x12   :  { %860 = dma.done.wait [#allocation10], 2048  }
  0x13   :  { %861 = vsyncadd [#allocation10], 4294965248  ;;  %v870_v0 = vmov 0.0   ;;  %v244_v1 = vld [vmem:[#allocation6 + $0x178] sm:$0xff]  ;;  %v243_v2 = vld [vmem:[#allocation6 + $0x170] sm:$0xff]  ;;  %s685_s9 = sshll.u32 %s1112_s8, 4  ;;  %s686_s9 = int_to_ptr.hbm [resolvable:$true] %s685_s9 }
  0x14   :  { %93 = vst [vmem:[#allocation2] sm:$0x1] %v870_v0  ;;  %v165_v3 = vld [vmem:[#allocation6 + $0xf8] sm:$0xff]  ;;  %245 = vmatpush.msra.mxu2 %v244_v1  ;;  %v164_v5 = vld [vmem:[#allocation6 + $0xf0] sm:$0xff]  ;;  %v242_v6 = vld [vmem:[#allocation6 + $0x168] sm:$0xff] }
  0x15   :  { %94 = vst [vmem:[#allocation2 + $0x18] sm:$0x1] %v870_v0  ;;  %166 = vmatpush.msra.mxu0 %v165_v3  ;;  %v144_v4 = vld [vmem:[#allocation6 + $0x78] sm:$0xff]  ;;  %v143_v7 = vld [vmem:[#allocation6 + $0x70] sm:$0xff]  ;;  %v163_v8 = vld [vmem:[#allocation6 + $0xe8] sm:$0xff] }
  0x16   :  { %95 = vst [vmem:[#allocation2 + $0x11] sm:$0x1] %v870_v0  ;;  %195 = vmatpush.msra.mxu1 %v144_v4  ;;  %246 = vmatpush.msra.mxu2 %v243_v2  ;;  %v142_v9 = vld [vmem:[#allocation6 + $0x68] sm:$0xff]  ;;  %v241_v10 = vld [vmem:[#allocation6 + $0x160] sm:$0xff]  ;;  %v240_v13 = vld [vmem:[#allocation6 + $0x158] sm:$0xff] }
  0x17   :  { %96 = vst [vmem:[#allocation2 + $0x29] sm:$0x1] %v870_v0  ;;  %167 = vmatpush.msra.mxu0 %v164_v5  ;;  %v162_v11 = vld [vmem:[#allocation6 + $0xe0] sm:$0xff]  ;;  %v161_v14 = vld [vmem:[#allocation6 + $0xd8] sm:$0xff]  ;;  %v239_v16 = vld [vmem:[#allocation6 + $0x150] sm:$0xff] }
  0x18   :  { %196 = vmatpush.msra.mxu1 %v143_v7  ;;  %247 = vmatpush.msra.mxu2 %v242_v6  ;;  %v141_v12 = vld [vmem:[#allocation6 + $0x60] sm:$0xff]  ;;  %v140_v15 = vld [vmem:[#allocation6 + $0x58] sm:$0xff]  ;;  %v160_v17 = vld [vmem:[#allocation6 + $0xd0] sm:$0xff] }
  0x19   :  { %168 = vmatpush.msra.mxu0 %v163_v8  ;;  %v139_v18 = vld [vmem:[#allocation6 + $0x50] sm:$0xff]  ;;  %v238_v19 = vld [vmem:[#allocation6 + $0x148] sm:$0xff]  ;;  %v237_v22 = vld [vmem:[#allocation6 + $0x140] sm:$0xff] }
  0x1a   :  { %197 = vmatpush.msra.mxu1 %v142_v9  ;;  %248 = vmatpush.msra.mxu2 %v241_v10  ;;  %v159_v20 = vld [vmem:[#allocation6 + $0xc8] sm:$0xff]  ;;  %v158_v23 = vld [vmem:[#allocation6 + $0xc0] sm:$0xff]  ;;  %v236_v25 = vld [vmem:[#allocation6 + $0x138] sm:$0xff] }
  0x1b   :  { %169 = vmatpush.msra.mxu0 %v162_v11  ;;  %v138_v21 = vld [vmem:[#allocation6 + $0x48] sm:$0xff]  ;;  %v137_v24 = vld [vmem:[#allocation6 + $0x40] sm:$0xff]  ;;  %v157_v26 = vld [vmem:[#allocation6 + $0xb8] sm:$0xff] }
  0x1c   :  { %198 = vmatpush.msra.mxu1 %v141_v12  ;;  %249 = vmatpush.msra.mxu2 %v240_v13  ;;  %v941_v27 = vld [vmem:[#allocation3] sm:$0xff]  ;;  %v136_v28 = vld [vmem:[#allocation6 + $0x38] sm:$0xff]  ;;  %v943_v29 = vld [vmem:[#allocation3 + $0x8] sm:$0xff] }
  0x1d   :  { %170 = vmatpush.msra.mxu0 %v161_v14  ;;  %121 = vst [vmem:[#allocation2 + $0x1] sm:$0xff] %v941_v27  ;;  %v235_v30 = vld [vmem:[#allocation6 + $0x130] sm:$0xff]  ;;  %v949_v34 = vld [vmem:[#allocation3 + $0x18] sm:$0xff]  ;;  %v234_v35 = vld [vmem:[#allocation6 + $0x128] sm:$0xff] }
  0x1e   :  { %199 = vmatpush.msra.mxu1 %v140_v15  ;;  %250 = vmatpush.msra.mxu2 %v239_v16  ;;  %v156_v31 = vld [vmem:[#allocation6 + $0xb0] sm:$0xff]  ;;  %122 = vst [vmem:[#allocation2 + $0x9] sm:$0xff] %v943_v29  ;;  %v155_v36 = vld [vmem:[#allocation6 + $0xa8] sm:$0xff]  ;;  %v233_v38 = vld [vmem:[#allocation6 + $0x120] sm:$0xff] }
  0x1f   :  { %171 = vmatpush.msra.mxu0 %v160_v17  ;;  %v947_v32 = vld [vmem:[#allocation3 + $0x10] sm:$0xff]  ;;  %124 = vst [vmem:[#allocation2 + $0x21] sm:$0xff] %v949_v34  ;;  %v134_v37 = vld [vmem:[#allocation6 + $0x28] sm:$0xff]  ;;  %v154_v39 = vld [vmem:[#allocation6 + $0xa0] sm:$0xff] }
  0x20   :  { %200 = vmatpush.msra.mxu1 %v139_v18  ;;  %251 = vmatpush.msra.mxu2 %v238_v19  ;;  %v135_v33 = vld [vmem:[#allocation6 + $0x30] sm:$0xff]  ;;  %123 = vst [vmem:[#allocation2 + $0x19] sm:$0xff] %v947_v32  ;;  %v133_v40 = vld [vmem:[#allocation6 + $0x20] sm:$0xff]  ;;  %v232_v41 = vld [vmem:[#allocation6 + $0x118] sm:$0xff] }
  0x21   :  { %172 = vmatpush.msra.mxu0 %v159_v20  ;;  %v153_v42 = vld [vmem:[#allocation6 + $0x98] sm:$0xff]  ;;  %v231_v44 = vld [vmem:[#allocation6 + $0x110] sm:$0xff]  ;;  %v230_v47 = vld [vmem:[#allocation6 + $0x108] sm:$0xff] }
  0x22   :  { %201 = vmatpush.msra.mxu1 %v138_v21  ;;  %252 = vmatpush.msra.mxu2 %v237_v22  ;;  %v132_v43 = vld [vmem:[#allocation6 + $0x18] sm:$0xff]  ;;  %v152_v45 = vld [vmem:[#allocation6 + $0x90] sm:$0xff]  ;;  %v151_v48 = vld [vmem:[#allocation6 + $0x88] sm:$0xff] }
  0x23   :  { %173 = vmatpush.msra.mxu0 %v158_v23  ;;  %v131_v46 = vld [vmem:[#allocation6 + $0x10] sm:$0xff]  ;;  %v130_v49 = vld [vmem:[#allocation6 + $0x8] sm:$0xff]  ;;  %v229_v50 = vld [vmem:[#allocation6 + $0x100] sm:$0xff] }
  0x24   :  { %202 = vmatpush.msra.mxu1 %v137_v24  ;;  %253 = vmatpush.msra.mxu2 %v236_v25  ;;  %v150_v51 = vld [vmem:[#allocation6 + $0x80] sm:$0xff]  ;;  %v125_v54 = vld [vmem:[#allocation2] sm:$0xff]  ;;  %v957_v61 = vld [vmem:[#allocation9 + $0x78] sm:$0xff] }
  0x25   :  { %174 = vmatpush.msra.mxu0 %v157_v26  ;;  %v224_v52 = vld [vmem:[#allocation2 + $0x2] sm:$0xff]  ;;  %v129_v53 = vld [vmem:[#allocation6] sm:$0xff]  ;;  %287 = vmatpush.msra.mxu3 %v957_v61  ;;  %v964_v63 = vld [vmem:[#allocation9 + $0x68] sm:$0xff] }
  0x26   :  { %203 = vmatpush.msra.mxu1 %v136_v28  ;;  %254 = vmatpush.msra.mxu2 %v235_v30  ;;  %v225_v55 = vld [vmem:[#allocation2 + $0xa] sm:$0xff]  ;;  %v227_v59 = vld [vmem:[#allocation2 + $0x22] sm:$0xff]  ;;  %v980_v3 = vld [vmem:[#allocation9 + $0x48] sm:$0xff] }
  0x27   :  { %175 = vmatpush.msra.mxu0 %v156_v31  ;;  %v126_v56 = vld [vmem:[#allocation2 + $0x8] sm:$0xff]  ;;  %v226_v57 = vld [vmem:[#allocation2 + $0x1a] sm:$0xff]  ;;  %v969_v0 = vld [vmem:[#allocation9 + $0x60] sm:$0xff] }
  0x28   :  { %204 = vmatpush.msra.mxu1 %v135_v33  ;;  %255 = vmatpush.msra.mxu2 %v234_v35  ;;  %v127_v58 = vld [vmem:[#allocation2 + $0x18] sm:$0xff]  ;;  %v128_v60 = vld [vmem:[#allocation2 + $0x20] sm:$0xff]  ;;  %v973_v1 = vld [vmem:[#allocation9 + $0x58] sm:$0xff] }
  0x29   :  { %176 = vmatpush.msra.mxu0 %v155_v36  ;;  %v961_v62 = vld [vmem:[#allocation9 + $0x70] sm:$0xff]  ;;  %v985_v4 = vld [vmem:[#allocation9 + $0x40] sm:$0xff]  ;;  %v989_v5 = vld [vmem:[#allocation9 + $0x38] sm:$0xff] }
  0x2a   :  { %205 = vmatpush.msra.mxu1 %v134_v37  ;;  %256 = vmatpush.msra.mxu2 %v233_v38  ;;  %v977_v2 = vld [vmem:[#allocation9 + $0x50] sm:$0xff]  ;;  %v997_v9 = vld [vmem:[#allocation9 + $0x28] sm:$0xff]  ;;  %v999_v10 = vld [vmem:[#allocation9 + $0x20] sm:$0xff] }
  0x2b   :  { %177 = vmatpush.msra.mxu0 %v154_v39  ;;  %288 = vmatpush.msra.mxu3 %v961_v62  ;;  %v993_v8 = vld [vmem:[#allocation9 + $0x30] sm:$0xff]  ;;  %v1003_v11 = vld [vmem:[#allocation9 + $0x18] sm:$0xff]  ;;  %v1011_v16 = vld [vmem:[#allocation9 + $0x8] sm:$0xff] }
  0x2c   :  { %206 = vmatpush.msra.mxu1 %v133_v40  ;;  %257 = vmatpush.msra.mxu2 %v232_v41  ;;  %v1007_v13 = vld [vmem:[#allocation9 + $0x10] sm:$0xff]  ;;  %v1015_v17 = vld [vmem:[#allocation9] sm:$0xff] }
  0x2d   :  { %178 = vmatpush.msra.mxu0 %v153_v42  ;;  %289 = vmatpush.msra.mxu3 %v964_v63 }
  0x2e   :  { %207 = vmatpush.msra.mxu1 %v132_v43  ;;  %258 = vmatpush.msra.mxu2 %v231_v44 }
  0x2f   :  { %179 = vmatpush.msra.mxu0 %v152_v45  ;;  %290 = vmatpush.msra.mxu3 %v969_v0 }
  0x30   :  { %208 = vmatpush.msra.mxu1 %v131_v46  ;;  %259 = vmatpush.msra.mxu2 %v230_v47 }
  0x31   :  { %180 = vmatpush.msra.mxu0 %v151_v48  ;;  %291 = vmatpush.msra.mxu3 %v973_v1 }
  0x32   :  { %209 = vmatpush.msra.mxu1 %v130_v49  ;;  %260 = vmatpush.msra.mxu2 %v229_v50 }
  0x33   :  { %181 = vmatpush.msra.mxu0 %v150_v51  ;;  %261 = vmatmul.f32.vlgmr.msra.gmra.mxu2 %v224_v52 }
  0x34   :  { %210 = vmatpush.msra.mxu1 %v129_v53  ;;  %182 = vmatmul.f32.vlgmr.msra.gmra.mxu0 %v941_v27 }
  0x35   :  { %211 = vmatmul.f32.vlgmr.msra.gmra.mxu1 %v125_v54  ;;  %325 = vmatpush.msrb.mxu0 %v957_v61 }
  0x36   :  { %292 = vmatpush.msra.mxu3 %v977_v2 }
  0x37   :  { %326 = vmatpush.msrb.mxu0 %v961_v62 }
  0x38   :  { %293 = vmatpush.msra.mxu3 %v980_v3 }
  0x39   :  { %327 = vmatpush.msrb.mxu0 %v964_v63 }
  0x3a   :  { %294 = vmatpush.msra.mxu3 %v985_v4 }
  0x3b   :  { %264 = vmatmul.f32.gmra.mxu2 %v225_v55  ;;  %328 = vmatpush.msrb.mxu0 %v969_v0 }
  0x3c   :  { %185 = vmatmul.f32.gmra.mxu0 %v943_v29  ;;  %295 = vmatpush.msra.mxu3 %v989_v5 }
  0x3d   :  { %214 = vmatmul.f32.gmra.mxu1 %v126_v56  ;;  %329 = vmatpush.msrb.mxu0 %v973_v1 }
  0x3e   :  { %296 = vmatpush.msra.mxu3 %v993_v8 }
  0x3f   :  { %330 = vmatpush.msrb.mxu0 %v977_v2 }
  0x40   :  { %297 = vmatpush.msra.mxu3 %v997_v9 }
  0x41   :  { %331 = vmatpush.msrb.mxu0 %v980_v3 }
  0x42   :  { %298 = vmatpush.msra.mxu3 %v999_v10 }
  0x43   :  { %267 = vmatmul.f32.gmra.mxu2 %v226_v57  ;;  %332 = vmatpush.msrb.mxu0 %v985_v4 }
  0x44   :  { %188 = vmatmul.f32.gmra.mxu0 %v947_v32  ;;  %299 = vmatpush.msra.mxu3 %v1003_v11 }
  0x45   :  { %217 = vmatmul.f32.gmra.mxu1 %v127_v58  ;;  %333 = vmatpush.msrb.mxu0 %v989_v5 }
  0x46   :  { %300 = vmatpush.msra.mxu3 %v1007_v13 }
  0x47   :  { %334 = vmatpush.msrb.mxu0 %v993_v8 }
  0x48   :  { %301 = vmatpush.msra.mxu3 %v1011_v16 }
  0x49   :  { %335 = vmatpush.msrb.mxu0 %v997_v9 }
  0x4a   :  { %302 = vmatpush.msra.mxu3 %v1015_v17 }
  0x4b   :  { %270 = vmatmul.f32.gmra.mxu2 %v227_v59  ;;  %336 = vmatpush.msrb.mxu0 %v999_v10 }
  0x4c   :  { %191 = vmatmul.f32.gmra.mxu0 %v949_v34 }
  0x4d   :  { %220 = vmatmul.f32.gmra.mxu1 %v128_v60  ;;  %337 = vmatpush.msrb.mxu0 %v1003_v11 }
  0x4f   :  { %338 = vmatpush.msrb.mxu0 %v1007_v13 }
  0x51   :  { %339 = vmatpush.msrb.mxu0 %v1011_v16 }
  0x53   :  { %340 = vmatpush.msrb.mxu0 %v1015_v17 }
  0x55   :  { %562 = vmatpush.msra.mxu0 %v957_v61 }
  0x57   :  { %563 = vmatpush.msra.mxu0 %v961_v62 }
  0x59   :  { %564 = vmatpush.msra.mxu0 %v964_v63 }
  0x5b   :  { %565 = vmatpush.msra.mxu0 %v969_v0 }
  0x5d   :  { %566 = vmatpush.msra.mxu0 %v973_v1 }
  0x5f   :  { %567 = vmatpush.msra.mxu0 %v977_v2 }
  0x61   :  { %568 = vmatpush.msra.mxu0 %v980_v3 }
  0x63   :  { %569 = vmatpush.msra.mxu0 %v985_v4 }
  0x65   :  { %570 = vmatpush.msra.mxu0 %v989_v5 }
  0x67   :  { %571 = vmatpush.msra.mxu0 %v993_v8 }
  0x69   :  { %572 = vmatpush.msra.mxu0 %v997_v9 }
  0x6b   :  { %573 = vmatpush.msra.mxu0 %v999_v10 }
  0x6d   :  { %574 = vmatpush.msra.mxu0 %v1003_v11 }
  0x6f   :  { %575 = vmatpush.msra.mxu0 %v1007_v13 }
  0x71   :  { %576 = vmatpush.msra.mxu0 %v1011_v16 }
  0x73   :  { %577 = vmatpush.msra.mxu0 %v1015_v17 }
  0xb1   :  { %v183_v6 = vpop.f32.mrf.mxu0 }
  0xb2   :  { %v212_v7 = vpop.f32.mrf.mxu1 }
  0xb3   :  { %v213_v23 = vadd.f32 %v212_v7, %v183_v6 }
  0xb6   :  { %v262_v12 = vpop.f32.mrf.mxu2 }
  0xb7   :  { %v1029_v30 = vadd.f32 %v262_v12, %v213_v23  ;;  %v436_v23 = vld [vmem:[#allocation8 + $0xd8] sm:$0xff] }
  0xb9   :  { %v186_v14 = vpop.f32.mrf.mxu0 }
  0xba   :  { %v215_v15 = vpop.f32.mrf.mxu1 }
  0xbb   :  { %v216_v21 = vadd.f32 %v215_v15, %v186_v14  ;;  %v440_v15 = vld [vmem:[#allocation8 + $0xf8] sm:$0xff] }
  0xbc   :  { %441 = vmatpush.msrb.mxu1 %v440_v15  ;;  %v409_v15 = vld [vmem:[#allocation8 + $0x28] sm:$0xff] }
  0xbe   :  { %v265_v18 = vpop.f32.mrf.mxu2 }
  0xbf   :  { %v1026_v25 = vadd.f32 %v265_v18, %v216_v21  ;;  %v439_v18 = vld [vmem:[#allocation8 + $0xf0] sm:$0xff]  ;;  %v419_v21 = vld [vmem:[#allocation8 + $0x78] sm:$0xff] }
  0xc0   :  { %442 = vmatpush.msrb.mxu1 %v439_v18  ;;  %470 = vmatpush.msrb.mxu2 %v419_v21  ;;  %v509_v18 = vld [vmem:[#allocation8 + $0x128] sm:$0xff]  ;;  %v408_v21 = vld [vmem:[#allocation8 + $0x20] sm:$0xff] }
  0xc1   :  { %v189_v19 = vpop.f32.mrf.mxu0  ;;  %v278_v35 = vadd.f32 %v1026_v25, %v1029_v30 }
  0xc2   :  { %v218_v20 = vpop.f32.mrf.mxu1 }
  0xc3   :  { %v219_v24 = vadd.f32 %v218_v20, %v189_v19  ;;  %v438_v19 = vld [vmem:[#allocation8 + $0xe8] sm:$0xff]  ;;  %v437_v20 = vld [vmem:[#allocation8 + $0xe0] sm:$0xff] }
  0xc4   :  { %443 = vmatpush.msrb.mxu1 %v438_v19  ;;  %v426_v19 = vld [vmem:[#allocation8 + $0x88] sm:$0xff] }
  0xc6   :  { %v268_v22 = vpop.f32.mrf.mxu2  ;;  %444 = vmatpush.msrb.mxu1 %v437_v20 }
  0xc7   :  { %v1031_v31 = vadd.f32 %v268_v22, %v219_v24  ;;  %v519_v22 = vld [vmem:[#allocation8 + $0x178] sm:$0xff]  ;;  %v418_v24 = vld [vmem:[#allocation8 + $0x70] sm:$0xff] }
  0xc8   :  { %520 = vmatpush.msrb.mxu3 %v519_v22  ;;  %445 = vmatpush.msrb.mxu1 %v436_v23  ;;  %v508_v22 = vld [vmem:[#allocation8 + $0x120] sm:$0xff] }
  0xc9   :  { %v192_v26 = vpop.f32.mrf.mxu0  ;;  %v279_v37 = vadd.f32 %v278_v35, %v1031_v31  ;;  %471 = vmatpush.msrb.mxu2 %v418_v24  ;;  %v517_v35 = vld [vmem:[#allocation8 + $0x168] sm:$0xff]  ;;  %v425_v23 = vld [vmem:[#allocation8 + $0x80] sm:$0xff] }
  0xca   :  { %v221_v28 = vpop.f32.mrf.mxu1 }
  0xcb   :  { %v222_v33 = vadd.f32 %v221_v28, %v192_v26  ;;  %v518_v26 = vld [vmem:[#allocation8 + $0x170] sm:$0xff] }
  0xcc   :  { %v435_v28 = vld [vmem:[#allocation8 + $0xd0] sm:$0xff]  ;;  %521 = vmatpush.msrb.mxu3 %v518_v26  ;;  %v407_v26 = vld [vmem:[#allocation8 + $0x18] sm:$0xff] }
  0xcd   :  { %446 = vmatpush.msrb.mxu1 %v435_v28  ;;  %v507_v28 = vld [vmem:[#allocation8 + $0x118] sm:$0xff] }
  0xce   :  { %v271_v36 = vpop.f32.mrf.mxu2  ;;  %522 = vmatpush.msrb.mxu3 %v517_v35  ;;  %v113_v35 = vld [vmem:[%s1108_s4] sm:$0x1] }
  0xcf   :  { %v1038_v38 = vadd.f32 %v271_v36, %v222_v33  ;;  %v417_v33 = vld [vmem:[#allocation8 + $0x68] sm:$0xff] }
  0xd0   :  { %v434_v36 = vld [vmem:[#allocation8 + $0xc8] sm:$0xff]  ;;  %472 = vmatpush.msrb.mxu2 %v417_v33  ;;  %v406_v33 = vld [vmem:[#allocation8 + $0x10] sm:$0xff] }
  0xd1   :  { %v280_v39 = vadd.f32 %v279_v37, %v1038_v38  ;;  %v416_v37 = vld [vmem:[#allocation8 + $0x60] sm:$0xff]  ;;  %447 = vmatpush.msrb.mxu1 %v434_v36 }
  0xd2   :  { %473 = vmatpush.msrb.mxu2 %v416_v37  ;;  %v506_v37 = vld [vmem:[#allocation8 + $0x110] sm:$0xff] }
  0xd3   :  { %v281_v40 = vrot.slane %v280_v39, 4 }
  0xd5   :  { %v282_v41 = vadd.f32 %v281_v40, %v280_v39  ;;  %v516_v39 = vld [vmem:[#allocation8 + $0x160] sm:$0xff] }
  0xd6   :  { %v433_v40 = vld [vmem:[#allocation8 + $0xc0] sm:$0xff]  ;;  %523 = vmatpush.msrb.mxu3 %v516_v39  ;;  %v405_v39 = vld [vmem:[#allocation8 + $0x8] sm:$0xff] }
  0xd7   :  { %v283_v42 = vrot.slane %v282_v41, 2  ;;  %448 = vmatpush.msrb.mxu1 %v433_v40  ;;  %v505_v40 = vld [vmem:[#allocation8 + $0x108] sm:$0xff] }
  0xd9   :  { %v284_v43 = vadd.f32 %v283_v42, %v282_v41 }
  0xdb   :  { %v285_v44 = vrot.slane %v284_v43, 1 }
  0xdd   :  { %v286_v45 = vadd.f32 %v285_v44, %v284_v43  ;;  %v415_v43 = vld [vmem:[#allocation8 + $0x58] sm:$0xff] }
  0xde   :  { %v515_v44 = vld [vmem:[#allocation8 + $0x158] sm:$0xff]  ;;  %474 = vmatpush.msrb.mxu2 %v415_v43 }
  0xdf   :  { %303 = vmatmul.f32.vlgmr.msra.gmra.mxu3 %v286_v45  ;;  %v432_v45 = vld [vmem:[#allocation8 + $0xb8] sm:$0xff] }
  0xe0   :  { %524 = vmatpush.msrb.mxu3 %v515_v44  ;;  %449 = vmatpush.msrb.mxu1 %v432_v45  ;;  %v404_v44 = vld [vmem:[#allocation8] sm:$0xff] }
  0xe1   :  { %v504_v45 = vld [vmem:[#allocation8 + $0x100] sm:$0xff] }
 0x162   :  { %v1049_v46 = vpop.f32.mrf.mxu3 }
 0x163   :  { %v307_v47 = vperm.slane %v1049_v46, 0 }
 0x165   :  { %v308_v48 = vsub.f32 %v1029_v30, %v307_v47  ;;  %v309_v49 = vsub.f32 %v1026_v25, %v307_v47  ;;  %v310_v50 = vsub.f32 %v1031_v31, %v307_v47  ;;  %v311_v51 = vsub.f32 %v1038_v38, %v307_v47  ;;  %v414_v47 = vld [vmem:[#allocation8 + $0x50] sm:$0xff] }
 0x166   :  { %475 = vmatpush.msrb.mxu2 %v414_v47 }
 0x167   :  { %v312_v52 = vmul.f32 %v308_v48, %v308_v48  ;;  %v313_v53 = vmul.f32 %v309_v49, %v309_v49  ;;  %v314_v54 = vmul.f32 %v310_v50, %v310_v50  ;;  %v315_v56 = vmul.f32 %v311_v51, %v311_v51  ;;  %v514_v48 = vld [vmem:[#allocation8 + $0x150] sm:$0xff]  ;;  %v413_v50 = vld [vmem:[#allocation8 + $0x48] sm:$0xff] }
 0x168   :  { %v431_v49 = vld [vmem:[#allocation8 + $0xb0] sm:$0xff]  ;;  %525 = vmatpush.msrb.mxu3 %v514_v48  ;;  %v513_v51 = vld [vmem:[#allocation8 + $0x148] sm:$0xff]  ;;  %476 = vmatpush.msrb.mxu2 %v413_v50 }
 0x169   :  { %v316_v55 = vadd.f32 %v313_v53, %v312_v52  ;;  %450 = vmatpush.msrb.mxu1 %v431_v49  ;;  %v430_v52 = vld [vmem:[#allocation8 + $0xa8] sm:$0xff]  ;;  %v412_v53 = vld [vmem:[#allocation8 + $0x40] sm:$0xff] }
 0x16a   :  { %526 = vmatpush.msrb.mxu3 %v513_v51  ;;  %477 = vmatpush.msrb.mxu2 %v412_v53 }
 0x16b   :  { %v317_v57 = vadd.f32 %v316_v55, %v314_v54  ;;  %v512_v54 = vld [vmem:[#allocation8 + $0x140] sm:$0xff]  ;;  %451 = vmatpush.msrb.mxu1 %v430_v52 }
 0x16c   :  { %v429_v55 = vld [vmem:[#allocation8 + $0xa0] sm:$0xff]  ;;  %527 = vmatpush.msrb.mxu3 %v512_v54 }
 0x16d   :  { %v318_v58 = vadd.f32 %v317_v57, %v315_v56  ;;  %v411_v57 = vld [vmem:[#allocation8 + $0x38] sm:$0xff]  ;;  %452 = vmatpush.msrb.mxu1 %v429_v55 }
 0x16e   :  { %478 = vmatpush.msrb.mxu2 %v411_v57 }
 0x16f   :  { %v319_v59 = vrot.slane %v318_v58, 4 }
 0x171   :  { %v320_v60 = vadd.f32 %v319_v59, %v318_v58  ;;  %v511_v58 = vld [vmem:[#allocation8 + $0x138] sm:$0xff] }
 0x172   :  { %v428_v59 = vld [vmem:[#allocation8 + $0x98] sm:$0xff]  ;;  %528 = vmatpush.msrb.mxu3 %v511_v58 }
 0x173   :  { %v321_v6 = vrot.slane %v320_v60, 2  ;;  %453 = vmatpush.msrb.mxu1 %v428_v59 }
 0x175   :  { %v322_v7 = vadd.f32 %v321_v6, %v320_v60  ;;  %v410_v6 = vld [vmem:[#allocation8 + $0x30] sm:$0xff] }
 0x176   :  { %479 = vmatpush.msrb.mxu2 %v410_v6 }
 0x177   :  { %v323_v12 = vrot.slane %v322_v7, 1 }
 0x178   :  { %480 = vmatpush.msrb.mxu2 %v409_v15 }
 0x179   :  { %v324_v14 = vadd.f32 %v323_v12, %v322_v7  ;;  %v510_v7 = vld [vmem:[#allocation8 + $0x130] sm:$0xff] }
 0x17a   :  { %529 = vmatpush.msrb.mxu3 %v510_v7  ;;  %481 = vmatpush.msrb.mxu2 %v408_v21 }
 0x17b   :  { %341 = vmatmul.f32.vlgmr.msrb.gmra.mxu0 %v324_v14  ;;  %v427_v14 = vld [vmem:[#allocation8 + $0x90] sm:$0xff] }
 0x17c   :  { %454 = vmatpush.msrb.mxu1 %v427_v14  ;;  %530 = vmatpush.msrb.mxu3 %v509_v18 }
 0x17d   :  { %482 = vmatpush.msrb.mxu2 %v407_v26 }
 0x17e   :  { %455 = vmatpush.msrb.mxu1 %v426_v19  ;;  %531 = vmatpush.msrb.mxu3 %v508_v22 }
 0x17f   :  { %483 = vmatpush.msrb.mxu2 %v406_v33 }
 0x180   :  { %456 = vmatpush.msrb.mxu1 %v425_v23  ;;  %532 = vmatpush.msrb.mxu3 %v507_v28 }
 0x181   :  { %484 = vmatpush.msrb.mxu2 %v405_v39 }
 0x182   :  { %600 = vmatpush.msra.mxu1 %v957_v61  ;;  %533 = vmatpush.msrb.mxu3 %v506_v37 }
 0x183   :  { %485 = vmatpush.msrb.mxu2 %v404_v44 }
 0x184   :  { %601 = vmatpush.msra.mxu1 %v961_v62  ;;  %534 = vmatpush.msrb.mxu3 %v505_v40 }
 0x186   :  { %602 = vmatpush.msra.mxu1 %v964_v63  ;;  %535 = vmatpush.msrb.mxu3 %v504_v45 }
 0x188   :  { %603 = vmatpush.msra.mxu1 %v969_v0 }
 0x18a   :  { %604 = vmatpush.msra.mxu1 %v973_v1 }
 0x18c   :  { %605 = vmatpush.msra.mxu1 %v977_v2 }
 0x18e   :  { %606 = vmatpush.msra.mxu1 %v980_v3 }
 0x190   :  { %607 = vmatpush.msra.mxu1 %v985_v4 }
 0x192   :  { %608 = vmatpush.msra.mxu1 %v989_v5 }
 0x194   :  { %609 = vmatpush.msra.mxu1 %v993_v8 }
 0x196   :  { %610 = vmatpush.msra.mxu1 %v997_v9 }
 0x198   :  { %611 = vmatpush.msra.mxu1 %v999_v10 }
 0x19a   :  { %612 = vmatpush.msra.mxu1 %v1003_v11 }
 0x19c   :  { %613 = vmatpush.msra.mxu1 %v1007_v13 }
 0x19e   :  { %614 = vmatpush.msra.mxu1 %v1011_v16 }
 0x1a0   :  { %615 = vmatpush.msra.mxu1 %v1015_v17 }
 0x1f8   :  { %v342_v41 = vpop.f32.mrf.mxu0 }
 0x1f9   :  { %v1056_v42 = vadd.f32 1e-05, %v342_v41 }
 0x1fb   :  { %716 = vrsqrt.f32 %v1056_v42  ;;  %vm351_vm1 = vweird.f32 %v1056_v42 }
 0x201   :  { %v717_v56 = vpop.eup %716 }
 0x202   :  { %v346_v60 = vmul.f32 %v717_v56, %v1056_v42  ;;  %vm352_vm0 = vweird.f32 %v717_v56  ;;  %v114_v42 = vld [vmem:[%s1109_s5] sm:$0x1] }
 0x203   :  { %vm353_vm2 = vmor %vm351_vm1, %vm352_vm0 }
 0x204   :  { %v347_v12 = vmul.f32 %v717_v56, %v346_v60 }
 0x206   :  { %v348_v20 = vmul.f32 0.5, %v347_v12 }
 0x208   :  { %v349_v24 = vsub.f32 1.5, %v348_v20 }
 0x20a   :  { %v350_v36 = vmul.f32 %v717_v56, %v349_v24 }
 0x20c   :  { %v354_v41 = vsel %vm353_vm2, %v717_v56, %v350_v36 }
 0x20d   :  { %v355_v43 = vmul.f32 %v354_v41, %v113_v35 }
 0x20f   :  { %v356_v47 = vmul.f32 %v355_v43, %v1049_v46  ;;  %v359_v48 = vperm.slane %v355_v43, 0 }
 0x211   :  { %v357_v61 = vsub.f32 %v114_v42, %v356_v47  ;;  %v361_v49 = vmul.f32 %v359_v48, %v1029_v30  ;;  %v362_v62 = vmul.f32 %v359_v48, %v1026_v25  ;;  %v363_v50 = vmul.f32 %v359_v48, %v1031_v31 }
 0x212   :  { %v364_v51 = vmul.f32 %v359_v48, %v1038_v38 }
 0x213   :  { %v366_v52 = vperm.slane %v357_v61, 0 }
 0x215   :  { %v368_v46 = vadd.f32 %v366_v52, %v361_v49  ;;  %v369_v53 = vadd.f32 %v366_v52, %v362_v62  ;;  %v370_v54 = vadd.f32 %v366_v52, %v363_v50  ;;  %v371_v63 = vadd.f32 %v366_v52, %v364_v51 }
 0x217   :  { %v376_v0 = vmin.f32 %v368_v46, 0.0  ;;  %v377_v55 = vmin.f32 %v369_v53, 0.0  ;;  %v378_v30 = vmin.f32 %v370_v54, 0.0  ;;  %v379_v56 = vmin.f32 %v371_v63, 0.0 }
 0x218   :  { %vm372_vm3 = vcmp.gt.f32.partialorder %v368_v46, 0.0  ;;  %vm373_vm4 = vcmp.gt.f32.partialorder %v369_v53, 0.0  ;;  %vm374_vm5 = vcmp.gt.f32.partialorder %v370_v54, 0.0  ;;  %vm375_vm6 = vcmp.gt.f32.partialorder %v371_v63, 0.0 }
 0x219   :  { %v380_v25 = vmul.f32 1.442695, %v376_v0  ;;  %v382_v31 = vmul.f32 1.442695, %v377_v55  ;;  %v384_v38 = vmul.f32 1.442695, %v378_v30 }
 0x21a   :  { %v386_v57 = vmul.f32 1.442695, %v379_v56 }
 0x21b   :  { %718 = vpow2.f32 %v380_v25 }
 0x21c   :  { %720 = vpow2.f32 %v382_v31 }
 0x21d   :  { %722 = vpow2.f32 %v384_v38 }
 0x21e   :  { %724 = vpow2.f32 %v386_v57 }
 0x221   :  { %v719_v1 = vpop.eup %718 }
 0x222   :  { %v721_v2 = vpop.eup %720  ;;  %v700_v3 = vadd.f32 -1.0, %v719_v1 }
 0x223   :  { %v723_v4 = vpop.eup %722  ;;  %v701_v58 = vadd.f32 -1.0, %v721_v2 }
 0x224   :  { %v725_v59 = vpop.eup %724  ;;  %v702_v5 = vadd.f32 -1.0, %v723_v4  ;;  %v392_v60 = vsel %vm372_vm3, %v368_v46, %v700_v3 }
 0x225   :  { %v703_v8 = vadd.f32 -1.0, %v725_v59  ;;  %v393_v6 = vsel %vm373_vm4, %v369_v53, %v701_v58  ;;  %396 = vst [vmem:[#allocation2 + $0x1] sm:$0xff] %v392_v60  ;;  %457 = vmatmul.f32.vlgmr.msrb.gmra.mxu1 %v392_v60 }
 0x226   :  { %v394_v9 = vsel %vm374_vm5, %v370_v54, %v702_v5  ;;  %397 = vst [vmem:[#allocation2 + $0x9] sm:$0xff] %v393_v6 }
 0x227   :  { %v395_v10 = vsel %vm375_vm6, %v371_v63, %v703_v8  ;;  %398 = vst [vmem:[#allocation2 + $0x19] sm:$0xff] %v394_v9 }
 0x228   :  { %399 = vst [vmem:[#allocation2 + $0x21] sm:$0xff] %v395_v10 }
 0x22c   :  { %v400_v11 = vld [vmem:[#allocation2] sm:$0xff] }
 0x22d   :  { %486 = vmatmul.f32.vlgmr.msrb.gmra.mxu2 %v400_v11  ;;  %v499_v7 = vld [vmem:[#allocation2 + $0x2] sm:$0xff]  ;;  %460 = vmatmul.f32.gmra.mxu1 %v393_v6  ;;  %v500_v12 = vld [vmem:[#allocation2 + $0xa] sm:$0xff] }
 0x22e   :  { %536 = vmatmul.f32.vlgmr.msrb.gmra.mxu3 %v499_v7  ;;  %v401_v13 = vld [vmem:[#allocation2 + $0x8] sm:$0xff]  ;;  %v402_v14 = vld [vmem:[#allocation2 + $0x18] sm:$0xff] }
 0x22f   :  { %v501_v15 = vld [vmem:[#allocation2 + $0x1a] sm:$0xff]  ;;  %v502_v18 = vld [vmem:[#allocation2 + $0x22] sm:$0xff] }
 0x230   :  { %v403_v16 = vld [vmem:[#allocation2 + $0x20] sm:$0xff] }
 0x235   :  { %489 = vmatmul.f32.gmra.mxu2 %v401_v13  ;;  %463 = vmatmul.f32.gmra.mxu1 %v394_v9 }
 0x236   :  { %539 = vmatmul.f32.gmra.mxu3 %v500_v12  ;;  %v115_v12 = vld [vmem:[%s1110_s6] sm:$0x1]  ;;  %s871_s6 = smov [#allocation11]  }
 0x23d   :  { %492 = vmatmul.f32.gmra.mxu2 %v402_v14  ;;  %466 = vmatmul.f32.gmra.mxu1 %v395_v10 }
 0x23e   :  { %542 = vmatmul.f32.gmra.mxu3 %v501_v15 }
 0x245   :  { %495 = vmatmul.f32.gmra.mxu2 %v403_v16 }
 0x246   :  { %545 = vmatmul.f32.gmra.mxu3 %v502_v18  ;;  %v116_v18 = vld [vmem:[%s1111_s7] sm:$0x1]  ;;  %s683_s7 = sshll.u32 %s871_s6, 4  ;;  %s684_s7 = int_to_ptr.vmem [resolvable:$true] %s683_s7 }
 0x2a2   :  { %v458_v17 = vpop.f32.mrf.mxu1 }
 0x2aa   :  { %v461_v21 = vpop.f32.mrf.mxu1 }
 0x2b0   :  { %v487_v19 = vpop.f32.mrf.mxu2 }
 0x2b1   :  { %v537_v20 = vpop.f32.mrf.mxu3  ;;  %v488_v35 = vadd.f32 %v487_v19, %v458_v17 }
 0x2b2   :  { %v464_v24 = vpop.f32.mrf.mxu1 }
 0x2b3   :  { %v549_v39 = vadd.f32 %v537_v20, %v488_v35 }
 0x2b8   :  { %v490_v22 = vpop.f32.mrf.mxu2 }
 0x2b9   :  { %v540_v23 = vpop.f32.mrf.mxu3  ;;  %v491_v28 = vadd.f32 %v490_v22, %v461_v21 }
 0x2ba   :  { %v467_v41 = vpop.f32.mrf.mxu1 }
 0x2bb   :  { %v550_v37 = vadd.f32 %v540_v23, %v491_v28 }
 0x2bd   :  { %v553_v44 = vadd.f32 %v550_v37, %v549_v39 }
 0x2c0   :  { %v493_v26 = vpop.f32.mrf.mxu2 }
 0x2c1   :  { %v543_v33 = vpop.f32.mrf.mxu3  ;;  %v494_v36 = vadd.f32 %v493_v26, %v464_v24 }
 0x2c3   :  { %v551_v40 = vadd.f32 %v543_v33, %v494_v36 }
 0x2c5   :  { %v554_v47 = vadd.f32 %v553_v44, %v551_v40 }
 0x2c8   :  { %v496_v43 = vpop.f32.mrf.mxu2 }
 0x2c9   :  { %v497_v45 = vadd.f32 %v496_v43, %v467_v41  ;;  %v546_v42 = vpop.f32.mrf.mxu3 }
 0x2cb   :  { %v552_v48 = vadd.f32 %v546_v42, %v497_v45 }
 0x2cd   :  { %v555_v61 = vadd.f32 %v554_v47, %v552_v48 }
 0x2cf   :  { %v556_v49 = vrot.slane %v555_v61, 4 }
 0x2d1   :  { %v557_v62 = vadd.f32 %v556_v49, %v555_v61 }
 0x2d3   :  { %v558_v50 = vrot.slane %v557_v62, 2 }
 0x2d5   :  { %v559_v51 = vadd.f32 %v558_v50, %v557_v62 }
 0x2d7   :  { %v560_v52 = vrot.slane %v559_v51, 1 }
 0x2d9   :  { %v561_v46 = vadd.f32 %v560_v52, %v559_v51 }
 0x2db   :  { %578 = vmatmul.f32.vlgmr.msra.gmra.mxu0 %v561_v46 }
 0x358   :  { %v579_v53 = vpop.f32.mrf.mxu0 }
 0x359   :  { %v582_v54 = vperm.slane %v579_v53, 0 }
 0x35b   :  { %v583_v63 = vsub.f32 %v549_v39, %v582_v54  ;;  %v584_v0 = vsub.f32 %v550_v37, %v582_v54  ;;  %v585_v55 = vsub.f32 %v551_v40, %v582_v54  ;;  %v586_v30 = vsub.f32 %v552_v48, %v582_v54 }
 0x35d   :  { %v587_v56 = vmul.f32 %v583_v63, %v583_v63  ;;  %v588_v25 = vmul.f32 %v584_v0, %v584_v0  ;;  %v589_v31 = vmul.f32 %v585_v55, %v585_v55  ;;  %v590_v57 = vmul.f32 %v586_v30, %v586_v30 }
 0x35f   :  { %v591_v38 = vadd.f32 %v588_v25, %v587_v56 }
 0x361   :  { %v592_v1 = vadd.f32 %v591_v38, %v589_v31 }
 0x363   :  { %v593_v2 = vadd.f32 %v592_v1, %v590_v57 }
 0x365   :  { %v594_v3 = vrot.slane %v593_v2, 4 }
 0x367   :  { %v595_v4 = vadd.f32 %v594_v3, %v593_v2 }
 0x369   :  { %v596_v58 = vrot.slane %v595_v4, 2 }
 0x36b   :  { %v597_v59 = vadd.f32 %v596_v58, %v595_v4 }
 0x36d   :  { %v598_v5 = vrot.slane %v597_v59, 1 }
 0x36f   :  { %v599_v60 = vadd.f32 %v598_v5, %v597_v59 }
 0x371   :  { %616 = vmatmul.f32.vlgmr.msra.gmra.mxu1 %v599_v60 }
 0x3ee   :  { %v617_v8 = vpop.f32.mrf.mxu1 }
 0x3ef   :  { %v618_v6 = vadd.f32 1e-05, %v617_v8 }
 0x3f1   :  { %726 = vrsqrt.f32 %v618_v6  ;;  %vm626_vm8 = vweird.f32 %v618_v6 }
 0x3f7   :  { %v727_v9 = vpop.eup %726 }
 0x3f8   :  { %v621_v10 = vmul.f32 %v727_v9, %v618_v6  ;;  %vm627_vm7 = vweird.f32 %v727_v9 }
 0x3f9   :  { %vm628_vm9 = vmor %vm626_vm8, %vm627_vm7 }
 0x3fa   :  { %v622_v11 = vmul.f32 %v727_v9, %v621_v10 }
 0x3fc   :  { %v623_v7 = vmul.f32 0.5, %v622_v11 }
 0x3fe   :  { %v624_v13 = vsub.f32 1.5, %v623_v7 }
 0x400   :  { %v625_v14 = vmul.f32 %v727_v9, %v624_v13 }
 0x402   :  { %v629_v15 = vsel %vm628_vm9, %v727_v9, %v625_v14 }
 0x403   :  { %v630_v16 = vmul.f32 %v629_v15, %v115_v12 }
 0x405   :  { %v631_v17 = vmul.f32 %v630_v16, %v579_v53  ;;  %v634_v19 = vperm.slane %v630_v16, 0 }
 0x407   :  { %v632_v20 = vsub.f32 %v116_v18, %v631_v17  ;;  %v636_v21 = vmul.f32 %v634_v19, %v549_v39  ;;  %v637_v22 = vmul.f32 %v634_v19, %v550_v37  ;;  %v638_v23 = vmul.f32 %v634_v19, %v551_v40 }
 0x408   :  { %v639_v24 = vmul.f32 %v634_v19, %v552_v48 }
 0x409   :  { %v641_v26 = vperm.slane %v632_v20, 0 }
 0x40b   :  { %v643_v28 = vadd.f32 %v641_v26, %v636_v21  ;;  %v644_v33 = vadd.f32 %v641_v26, %v637_v22  ;;  %v645_v35 = vadd.f32 %v641_v26, %v638_v23  ;;  %v646_v36 = vadd.f32 %v641_v26, %v639_v24 }
 0x40d   :  { %v647_v41 = vadd.f32 %v643_v28, %v941_v27  ;;  %v648_v43 = vadd.f32 %v644_v33, %v943_v29  ;;  %v649_v44 = vadd.f32 %v645_v35, %v947_v32  ;;  %v650_v45 = vadd.f32 %v646_v36, %v949_v34 }
 0x40f   :  { %v655_v42 = vmin.f32 %v647_v41, 0.0  ;;  %v656_v47 = vmin.f32 %v648_v43, 0.0  ;;  %v657_v61 = vmin.f32 %v649_v44, 0.0  ;;  %v658_v39 = vmin.f32 %v650_v45, 0.0 }
 0x410   :  { %vm651_vm10 = vcmp.gt.f32.partialorder %v647_v41, 0.0  ;;  %vm652_vm11 = vcmp.gt.f32.partialorder %v648_v43, 0.0  ;;  %vm653_vm12 = vcmp.gt.f32.partialorder %v649_v44, 0.0  ;;  %vm654_vm13 = vcmp.gt.f32.partialorder %v650_v45, 0.0 }
 0x411   :  { %v659_v37 = vmul.f32 1.442695, %v655_v42  ;;  %v661_v40 = vmul.f32 1.442695, %v656_v47  ;;  %v663_v48 = vmul.f32 1.442695, %v657_v61 }
 0x412   :  { %v665_v49 = vmul.f32 1.442695, %v658_v39 }
 0x413   :  { %728 = vpow2.f32 %v659_v37 }
 0x414   :  { %730 = vpow2.f32 %v661_v40 }
 0x415   :  { %732 = vpow2.f32 %v663_v48 }
 0x416   :  { %734 = vpow2.f32 %v665_v49 }
 0x419   :  { %v729_v62 = vpop.eup %728 }
 0x41a   :  { %v731_v27 = vpop.eup %730  ;;  %v704_v50 = vadd.f32 -1.0, %v729_v62 }
 0x41b   :  { %v733_v29 = vpop.eup %732  ;;  %v705_v32 = vadd.f32 -1.0, %v731_v27 }
 0x41c   :  { %v735_v34 = vpop.eup %734  ;;  %v706_v51 = vadd.f32 -1.0, %v733_v29  ;;  %v671_v52 = vsel %vm651_vm10, %v647_v41, %v704_v50 }
 0x41d   :  { %v707_v46 = vadd.f32 -1.0, %v735_v34  ;;  %v672_v53 = vsel %vm652_vm11, %v648_v43, %v705_v32  ;;  %675 = vst [vmem:[#allocation11] sm:$0xff] %v671_v52 }
 0x41e   :  { %v673_v54 = vsel %vm653_vm12, %v649_v44, %v706_v51  ;;  %676 = vst [vmem:[#allocation11 + $0x8] sm:$0xff] %v672_v53 }
 0x41f   :  { %v674_v63 = vsel %vm654_vm13, %v650_v45, %v707_v46  ;;  %677 = vst [vmem:[#allocation11 + $0x10] sm:$0xff] %v673_v54 }
 0x420   :  { %678 = vst [vmem:[#allocation11 + $0x18] sm:$0xff] %v674_v63 }
 0x421   :  { %691 = dma.vmem_to_hbm [thread:$0]  %s684_s7, 512, %s686_s9, [#allocation5], %s865_s13, %s865_s13, %s866_s14  }
 0x422   :  { %862 = dma.done.wait [#allocation5], 512  }
 0x423   :  { %863 = vsyncadd [#allocation5], 4294966784 }
 0x424   :  { %696 = vsyncpa [#allocation4], 1 }
 0x425   :  { %697 = vsyncpa [#allocation7], 1 }
 0x426   :  { %698 = vsyncpa [#allocation10], 1 }
 0x427   :  { %699 = vsyncpa [#allocation5], 1 }

</bundles_post_ra>
